<compile_context>
chip_gen: v6e
topology: v6e:2x2x1
jax: 0.10.0
libtpu: 0.0.40
codegen_flags: <defaults>
</compile_context>

<pallas_src>
import functools

import jax
import jax.numpy as jnp
from jax.experimental import pallas as pl
from jax.experimental.pallas import tpu as pltpu

LRELU_SLOPE = 0.2
_LANE = 128
_VMEM_BUDGET = 40 * 1024 * 1024       # double-buffered block budget per call


def _round_up(x, m):
    return ((x + m - 1) // m) * m


# --------------------------------------------------------------------------
# Pallas kernels
# --------------------------------------------------------------------------
def _spectrogram_kernel(fr_ref, w_ref, o_ref, *, n_freq, f_pad):
    """|STFT| magnitude for one batch element / one time tile.

    fr_ref : (1, n_fft, t_tile)   frames
    w_ref  : (2*f_pad, n_fft)     stacked [cos ; sin] DFT basis * hann window
    o_ref  : (1, n_freq, t_tile)
    """
    # Single MXU pass over the frames (cos and sin stacked along M).
    cs = jnp.dot(w_ref[...], fr_ref[0], preferred_element_type=jnp.float32)
    re = cs[:n_freq]
    im = cs[f_pad:f_pad + n_freq]          # f_pad is sublane-aligned (mult of 8)
    o_ref[0] = jnp.sqrt(re * re + im * im).astype(o_ref.dtype)


def _conv2d_mxu_kernel(x_ref, w_ref, b_ref, o_ref, *, KH, n_q, CK, C_out,
                       H_out, w_tile, act):
    """Fused-tap conv: ONE MXU dot of depth KH*n_q*CK per output row.

    x_ref : (1, H_pad, CK, w_in)   halo time tile, CK = stride*C_in (polyphase)
    w_ref : (C_out, KH*n_q*CK)     all (kh, kw) taps fused into the contraction
    b_ref : (C_out, 1)
    o_ref : (1, H_out, C_out, w_tile)
    """
    w = w_ref[...]
    bias = jnp.broadcast_to(b_ref[...], (C_out, w_tile))   # hoisted out of loop

    def row(h, carry):
        # Assemble the (K, w_tile) operand straight from the VMEM block:
        # (kh, q) taps concatenated along the contraction (sublane) axis.
        xs = jnp.concatenate(
            [x_ref[0, h + kh, :, pl.ds(q, w_tile)]
             for kh in range(KH) for q in range(n_q)], axis=0)
        acc = jnp.dot(w, xs, preferred_element_type=jnp.float32) + bias
        if act:
            acc = jnp.where(acc >= 0, acc, LRELU_SLOPE * acc)
        o_ref[0, h] = acc.astype(o_ref.dtype)
        return carry

    if H_out <= 16:
        for h in range(H_out):          # static unroll: best scheduler visibility
            row(h, 0)
    else:
        # TODO(synk): batch 2-4 rows per dot (concat along lanes) to further
        # amortize the M=32 MXU underfill on v6e/v7x.
        jax.lax.fori_loop(0, H_out, row, 0, unroll=2)


def _conv2d_vpu_kernel(x_ref, w_ref, b_ref, o_ref, *, KH, KW, stride, C_out,
                       H_out, w_tile, act):
    """Depth-1 (C_in == 1, first layer) conv via VPU broadcast-FMA taps.

    x_ref : (1, H_pad, stride, w_in)
    w_ref : (KW, C_out, KH)
    b_ref : (C_out, 1)
    o_ref : (1, H_out, C_out, w_tile)
    """
    # TODO(synk): benchmark the fused MXU variant (K = KH*KW = 27) on v6e/v7x.
    bias = jnp.broadcast_to(b_ref[...], (C_out, w_tile))   # hoisted out of loop

    def row(h, carry):
        acc = bias
        for kw in range(KW):
            p, q = kw % stride, kw // stride
            for kh in range(KH):
                xr = x_ref[0, h + kh, pl.ds(p, 1), pl.ds(q, w_tile)]   # (1, wt)
                acc = acc + w_ref[kw, :, pl.ds(kh, 1)] * xr
        if act:
            acc = jnp.where(acc >= 0, acc, LRELU_SLOPE * acc)
        o_ref[0, h] = acc.astype(o_ref.dtype)
        return carry

    if H_out <= 16:
        for h in range(H_out):
            row(h, 0)
    else:
        jax.lax.fori_loop(0, H_out, row, 0, unroll=2)


# --------------------------------------------------------------------------
# Wrappers (padding, polyphase split, halo tiling, weight fusion, pallas_call)
# --------------------------------------------------------------------------
def spectrogram_forward(audio, n_fft, hop, win_length, *,
                        compute_dtype=jnp.float32, t_tile_max=512):
    """|STFT| (power=1, centered, periodic hann) -> (B, n_freq, n_frames)."""
    B, T = audio.shape
    half = n_fft // 2
    n_frames = 1 + T // hop
    n_freq = n_fft // 2 + 1
    f_pad = _round_up(n_freq, 8)
    itemsize = jnp.dtype(compute_dtype).itemsize

    # Lane-dense time tiles; >= 2 tiles when B == 1 (keep both v7x cores busy);
    # shrink until the double-buffered blocks fit the VMEM budget.
    t_tile = min(_round_up(t_tile_max, _LANE), _round_up(n_frames, _LANE))
    if B == 1 and t_tile >= 2 * _LANE:
        t_tile = min(t_tile, max(_LANE, _round_up(pl.cdiv(n_frames, 2), _LANE)))
    basis_bytes = 2 * f_pad * n_fft * itemsize

    def _vmem(t):
        return (2 * (n_fft + n_freq) * t * itemsize + 2 * basis_bytes
                + 2 * f_pad * t * 4)

    while t_tile > _LANE and _vmem(t_tile) > _VMEM_BUDGET:
        t_tile -= _LANE
    n_tt = pl.cdiv(n_frames, t_tile)
    n_frames_pad = n_tt * t_tile

    # Centered framing: reflect pad by n_fft//2, then zero-pad so every frame
    # of the lane-rounded time axis is in bounds (pad frames are cropped later).
    padded = jnp.pad(audio, ((0, 0), (half, half)), mode="reflect")
    need = n_fft + hop * (n_frames_pad - 1)
    if padded.shape[1] < need:
        padded = jnp.pad(padded, ((0, 0), (0, need - padded.shape[1])))
    # TODO(synk): the frame gather is n_fft/hop-fold redundant in HBM; building
    # frames in-kernel from a (hop*t_tile + n_fft) audio slab would cut the
    # spectrogram input traffic ~4-8x but needs in-kernel strided framing.
    idx = jnp.arange(n_fft)[:, None] + hop * jnp.arange(n_frames_pad)[None, :]
    frames = padded[:, idx].astype(compute_dtype)       # (B, n_fft, n_frames_pad)

    # Periodic hann folded into a single stacked [cos ; sin] DFT basis.
    n = jnp.arange(win_length, dtype=jnp.float32)
    win = 0.5 - 0.5 * jnp.cos(2.0 * jnp.pi * n / win_length)
    lpad = (n_fft - win_length) // 2
    win = jnp.pad(win, (lpad, n_fft - win_length - lpad))[None, :]
    ang = (2.0 * jnp.pi / n_fft) \
        * jnp.arange(n_freq, dtype=jnp.float32)[:, None] \
        * jnp.arange(n_fft, dtype=jnp.float32)[None, :]
    basis = jnp.zeros((2 * f_pad, n_fft), jnp.float32)
    basis = basis.at[:n_freq].set(jnp.cos(ang) * win)
    basis = basis.at[f_pad:f_pad + n_freq].set(jnp.sin(ang) * win)
    basis = basis.astype(compute_dtype)

    kernel = functools.partial(_spectrogram_kernel, n_freq=n_freq, f_pad=f_pad)
    spec = pl.pallas_call(
        kernel,
        out_shape=jax.ShapeDtypeStruct((B, n_freq, n_frames_pad), compute_dtype),
        grid=(B, n_tt),
        in_specs=[pl.BlockSpec((1, n_fft, t_tile), lambda b, t: (b, 0, t)),
                  pl.BlockSpec((2 * f_pad, n_fft), lambda b, t: (0, 0))],
        out_specs=pl.BlockSpec((1, n_freq, t_tile), lambda b, t: (b, 0, t)),
        compiler_params=pltpu.CompilerParams(
            dimension_semantics=("parallel", "parallel"),
            vmem_limit_bytes=int(min(64 * 2**20,
                                     max(32 * 2**20, 1.5 * _vmem(t_tile))))),
    )(frames, basis)
    return spec[..., :n_frames]


def conv2d_forward(x, w, b, *, stride_w, pad_h, pad_w, act,
                   compute_dtype=jnp.float32, w_tile_max=512):
    """Conv2d on (B, H, C_in, W) activations -> (B, H_out, C_out, W_out)."""
    B, H, C_in, W = x.shape
    C_out, C_in_w, KH, KW = w.shape
    assert C_in_w == C_in
    s = stride_w
    H_pad = H + 2 * pad_h
    H_out = H_pad - KH + 1
    W_out = (W + 2 * pad_w - KW) // s + 1
    n_q = -(-KW // s)              # taps per polyphase lane offset
    halo = n_q - 1
    CK = s * C_in
    itemsize = jnp.dtype(compute_dtype).itemsize

    # Lane-dense output tiles (multiple of 128); >= 2 tiles when B == 1 so both
    # v7x TensorCores are fed; shrink until 2*(in+out blocks) fits the budget.
    w_tile = min(_round_up(w_tile_max, _LANE), _round_up(W_out, _LANE))
    if B == 1 and w_tile >= 2 * _LANE:
        w_tile = min(w_tile, max(_LANE, _round_up(pl.cdiv(W_out, 2), _LANE)))

    def _vmem(wt):
        in_blk = H_pad * CK * (wt + halo) * itemsize
        out_blk = H_out * C_out * wt * itemsize
        xs_tmp = KH * n_q * CK * wt * itemsize
        return 2 * (in_blk + out_blk) + xs_tmp

    while w_tile > _LANE and _vmem(w_tile) > _VMEM_BUDGET:
        w_tile -= _LANE
    # TODO(synk): for very large n_fft (H_pad ~ 1k+) also tile H (frequency) so
    # the w_tile=128 input block fits v7x's 64 MiB VMEM.
    n_wt = pl.cdiv(W_out, w_tile)
    W_out_pad = n_wt * w_tile
    w_in = w_tile + halo
    Lph = W_out_pad + halo

    # Zero-pad H/W, polyphase-split time (stride-s taps -> unit-stride lanes),
    # then cut overlapping halo time tiles so each grid step's input block is a
    # bounded, pipelined DMA instead of the whole time axis per batch element.
    total_W = max(W + 2 * pad_w, s * Lph)
    x_pad = jnp.pad(x, ((0, 0), (pad_h, pad_h), (0, 0),
                        (pad_w, total_W - W - pad_w)))
    phases = [x_pad[..., p::s][..., :Lph] for p in range(s)]
    xph = jnp.stack(phases, axis=2).reshape(B, H_pad, CK, Lph)
    xt = jnp.stack([xph[..., wi * w_tile: wi * w_tile + w_in]
                    for wi in range(n_wt)], axis=1)
    xt = xt.reshape(B * n_wt, H_pad, CK, w_in).astype(compute_dtype)

    bk = b.reshape(C_out, 1).astype(jnp.float32)

    if C_in == 1:
        # First layer: depth-1 taps stay on the VPU (broadcast FMA).
        wk = jnp.transpose(w, (3, 0, 2, 1)).reshape(KW, C_out, KH)
        wk = wk.astype(compute_dtype)
        kernel = functools.partial(_conv2d_vpu_kernel, KH=KH, KW=KW, stride=s,
                                   C_out=C_out, H_out=H_out, w_tile=w_tile,
                                   act=act)
        w_spec = pl.BlockSpec((KW, C_out, KH), lambda bi, wi: (0, 0, 0))
    else:
        # Fuse ALL (kh, kw) taps into one contraction of depth KH*n_q*CK
        # (zero rows where q*s+p >= KW): a single MXU dot per output row.
        wf = jnp.zeros((C_out, KH, n_q, s, C_in), jnp.float32)
        for q in range(n_q):
            for p in range(s):
                kw = q * s + p
                if kw < KW:
                    wf = wf.at[:, :, q, p, :].set(
                        jnp.transpose(w[:, :, :, kw], (0, 2, 1)))
        K_fused = KH * n_q * CK
        wk = wf.reshape(C_out, K_fused).astype(compute_dtype)
        kernel = functools.partial(_conv2d_mxu_kernel, KH=KH, n_q=n_q, CK=CK,
                                   C_out=C_out, H_out=H_out, w_tile=w_tile,
                                   act=act)
        w_spec = pl.BlockSpec((C_out, K_fused), lambda bi, wi: (0, 0))

    out = pl.pallas_call(
        kernel,
        out_shape=jax.ShapeDtypeStruct((B, H_out, C_out, W_out_pad),
                                       compute_dtype),
        grid=(B, n_wt),
        in_specs=[
            pl.BlockSpec((1, H_pad, CK, w_in),
                         lambda bi, wi: (bi * n_wt + wi, 0, 0, 0)),
            w_spec,
            pl.BlockSpec((C_out, 1), lambda bi, wi: (0, 0)),
        ],
        out_specs=pl.BlockSpec((1, H_out, C_out, w_tile),
                               lambda bi, wi: (bi, 0, 0, wi)),
        compiler_params=pltpu.CompilerParams(
            dimension_semantics=("parallel", "parallel"),
            vmem_limit_bytes=int(min(64 * 2**20,
                                     max(32 * 2**20, 1.5 * _vmem(w_tile))))),
        # TODO(synk): single-buffer the grid-invariant weight/bias blocks
        # (pipeline_mode=pl.Buffered(1)) to free VMEM for larger tiles.
    )(xt, wk, bk)
    # Crop the tile-rounding pad (it holds bias+lrelu of zero-padded input).
    return out[..., :W_out]


def rsd_forward(params, x, *, compute_dtype=jnp.float32, w_tile_max=512):
    """x: (B, 1, T) audio -> (flat, fmap), matching RSD.forward."""
    n_fft, hop, win_length = params["resolution"]
    spec = spectrogram_forward(x[:, 0, :], n_fft, hop, win_length,
                               compute_dtype=compute_dtype)     # (B, F, Wt)
    y = spec[:, :, None, :]                      # (B, H=freq, C=1, W=time)
    fmap = []
    for layer in params["layers"]:
        sh, sw = layer["stride"]
        assert sh == 1, "RSD uses stride 1 along the frequency axis"
        y = conv2d_forward(y, layer["w"], layer["b"], stride_w=sw,
                           pad_h=layer["pad"][0], pad_w=layer["pad"][1],
                           act=True, compute_dtype=compute_dtype,
                           w_tile_max=w_tile_max)
        fmap.append(jnp.transpose(y, (0, 2, 1, 3)))   # (B, C, H, W) torch layout
    # TODO(synk): the C_out=1 projection could be folded into layer 5's epilogue
    # (needs a 3x3 activation halo) to save one activation read+write.
    y = conv2d_forward(y, params["proj_w"], params["proj_b"], stride_w=1,
                       pad_h=1, pad_w=1, act=False,
                       compute_dtype=compute_dtype, w_tile_max=w_tile_max)
    fmap.append(jnp.transpose(y, (0, 2, 1, 3)))
    flat = y.reshape(y.shape[0], -1)   # C==1: (H,1,W) flatten == torch's (1,H,W)
    return flat, fmap


# --------------------------------------------------------------------------
# Deterministic synthetic parameter init (weight_norm applied as w = g*v/||v||)
# --------------------------------------------------------------------------
def _weight_norm_init(key, shape):
    k1, k2, k3 = jax.random.split(key, 3)
    v = 0.5 * jax.random.normal(k1, shape, jnp.float32)
    g = 1.0 + 0.1 * jax.random.normal(k2, (shape[0], 1, 1, 1), jnp.float32)
    w = g * v / jnp.sqrt(jnp.sum(v * v, axis=(1, 2, 3), keepdims=True) + 1e-12)
    b = 0.1 * jax.random.normal(k3, (shape[0],), jnp.float32)
    return w, b


def init_rsd_params(key, resolution):
    layer_cfg = [
        # (C_in, C_out, (KH, KW), (SH, SW), (PH, PW))  -- exactly as in RSD
        (1, 32, (3, 9), (1, 1), (1, 4)),
        (32, 32, (3, 9), (1, 2), (1, 4)),
        (32, 32, (3, 9), (1, 2), (1, 4)),
        (32, 32, (3, 9), (1, 2), (1, 4)),
        (32, 32, (3, 3), (1, 1), (1, 1)),
    ]
    layers = []
    for cin, cout, k, st, p in layer_cfg:
        key, sub = jax.random.split(key)
        w, b = _weight_norm_init(sub, (cout, cin, k[0], k[1]))
        layers.append(dict(w=w, b=b, stride=st, pad=p))
    key, sub = jax.random.split(key)
    pw_, pb_ = _weight_norm_init(sub, (1, 32, 3, 3))
    return dict(resolution=tuple(resolution), layers=layers,
                proj_w=pw_, proj_b=pb_)


# --------------------------------------------------------------------------
# Pure-JAX reference (for correctness check against the Pallas kernels)
# --------------------------------------------------------------------------
def _conv2d_ref(x, w, b, stride, pad):
    out = jax.lax.conv_general_dilated(
        x, w, window_strides=stride,
        padding=[(pad[0], pad[0]), (pad[1], pad[1])],
        dimension_numbers=("NCHW", "OIHW", "NCHW"),
        precision=jax.lax.Precision.HIGHEST)
    return out + b[None, :, None, None]


def _spectrogram_ref(audio, n_fft, hop, win_length):
    B, T = audio.shape
    half = n_fft // 2
    padded = jnp.pad(audio, ((0, 0), (half, half)), mode="reflect")
    n_frames = 1 + T // hop
    idx = hop * jnp.arange(n_frames)[:, None] + jnp.arange(n_fft)[None, :]
    frames = padded[:, idx]                               # (B, n_frames, n_fft)
    n = jnp.arange(win_length, dtype=jnp.float32)
    win = 0.5 - 0.5 * jnp.cos(2.0 * jnp.pi * n / win_length)
    lpad = (n_fft - win_length) // 2
    win = jnp.pad(win, (lpad, n_fft - win_length - lpad))
    spec = jnp.abs(jnp.fft.rfft(frames * win[None, None, :], axis=-1))
    return jnp.transpose(spec, (0, 2, 1))                 # (B, n_freq, n_frames)


def rsd_ref(params, x):
    n_fft, hop, win_length = params["resolution"]
    xs = _spectrogram_ref(x[:, 0, :], n_fft, hop, win_length)[:, None]  # (B,1,F,W)
    fmap = []
    for layer in params["layers"]:
        xs = _conv2d_ref(xs, layer["w"], layer["b"], layer["stride"], layer["pad"])
        xs = jnp.where(xs >= 0, xs, LRELU_SLOPE * xs)
        fmap.append(xs)
    xs = _conv2d_ref(xs, params["proj_w"], params["proj_b"], (1, 1), (1, 1))
    fmap.append(xs)
    return xs.reshape(xs.shape[0], -1), fmap


# --------------------------------------------------------------------------
if __name__ == "__main__":
    key = jax.random.PRNGKey(0)
    resolution = (16, 4, 16)          # (n_fft, hop_length, win_length), small
    B, T = 2, 128                     # -> 9 freq bins x 33 frames

    kp, kx = jax.random.split(key)
    params = init_rsd_params(kp, resolution)
    x = jax.random.normal(kx, (B, 1, T), jnp.float32)

    # f32 path: tight check against the pure-JAX reference.
    out, fmap = rsd_forward(params, x, compute_dtype=jnp.float32)
    out = jax.block_until_ready(out)
    ref_out, ref_fmap = rsd_ref(params, x)
    assert out.shape == ref_out.shape, (out.shape, ref_out.shape)
    assert jnp.allclose(out, ref_out, atol=5e-3, rtol=5e-3)
    assert len(fmap) == len(ref_fmap) == 6
    for a, r in zip(fmap, ref_fmap):
        assert a.shape == r.shape, (a.shape, r.shape)
        assert jnp.allclose(a, r, atol=5e-3, rtol=5e-3)

    # bf16-operand path (recommended on v6e/v7x MXU; f32 accumulation in-kernel).
    out_bf16, _ = rsd_forward(params, x, compute_dtype=jnp.bfloat16)
    out_bf16 = jax.block_until_ready(out_bf16)
    assert out_bf16.shape == ref_out.shape
    assert bool(jnp.all(jnp.isfinite(out_bf16.astype(jnp.float32))))

    print("KERNEL_OK")
</pallas_src>

<mosaic_0001>
module attributes {stable_mosaic.version = 11 : i64} {
  func.func @_spectrogram_kernel(%arg0: i32, %arg1: i32, %arg2: memref<1x16x128xf32, #tpu.memory_space<vmem>>, %arg3: memref<32x16xf32, #tpu.memory_space<vmem>>, %arg4: memref<1x9x128xf32, #tpu.memory_space<vmem>>) attributes {dimension_semantics = [#tpu.dimension_semantics<parallel>, #tpu.dimension_semantics<parallel>], iteration_bounds = array<i64: 2, 1>, scalar_prefetch = 0 : i64, scratch_operands = 0 : i64, tpu.core_type = #tpu.core_type<tc>, window_params = [{transform_indices = @transform_0, window_bounds = array<i64: 1, 16, 128>}, {pipeline_mode = #tpu.pipeline_mode<synchronous>, transform_indices = @transform_1, window_bounds = array<i64: 32, 16>}, {transform_indices = @transform_2, window_bounds = array<i64: 1, 9, 128>}]} {
    %c0 = arith.constant 0 : index
    %c0_0 = arith.constant 0 : index
    %0 = vector.load %arg3[%c0, %c0_0] : memref<32x16xf32, #tpu.memory_space<vmem>>, vector<32x16xf32>
    %c0_1 = arith.constant 0 : index
    %c0_2 = arith.constant 0 : index
    %c0_3 = arith.constant 0 : index
    %1 = vector.load %arg2[%c0_1, %c0_2, %c0_3] : memref<1x16x128xf32, #tpu.memory_space<vmem>>, vector<1x16x128xf32>
    %2 = vector.shape_cast %1 : vector<1x16x128xf32> to vector<16x128xf32>
    %cst = arith.constant dense<0.000000e+00> : vector<32x128xf32>
    %3 = tpu.matmul %0, %2, %cst {dimension_numbers = #tpu.dot_dimension_numbers<[1], [0], [0], [1], [0, 0, 1, 1], [], []>} : vector<32x16xf32>, vector<16x128xf32>, vector<32x128xf32> -> vector<32x128xf32>
    %4 = vector.extract_strided_slice %3 {offsets = [0, 0], sizes = [9, 128], strides = [1, 1]} : vector<32x128xf32> to vector<9x128xf32>
    %5 = vector.extract_strided_slice %3 {offsets = [16, 0], sizes = [9, 128], strides = [1, 1]} : vector<32x128xf32> to vector<9x128xf32>
    %6 = arith.mulf %4, %4 : vector<9x128xf32>
    %7 = arith.mulf %5, %5 : vector<9x128xf32>
    %8 = arith.addf %6, %7 : vector<9x128xf32>
    %9 = math.sqrt %8 : vector<9x128xf32>
    %c0_4 = arith.constant 0 : index
    %c0_5 = arith.constant 0 : index
    %c0_6 = arith.constant 0 : index
    %10 = vector.load %arg4[%c0_4, %c0_5, %c0_6] : memref<1x9x128xf32, #tpu.memory_space<vmem>>, vector<1x9x128xf32>
    %11 = vector.shape_cast %10 : vector<1x9x128xf32> to vector<9x128xf32>
    %12 = vector.shape_cast %9 : vector<9x128xf32> to vector<1x9x128xf32>
    tpu.vector_store %arg4[%c0_4, %c0_5, %c0_6], %12 {strides = array<i32>} : memref<1x9x128xf32, #tpu.memory_space<vmem>>, vector<1x9x128xf32>,
    return
  }
  func.func @transform_0(%arg0: i32, %arg1: i32) -> (i32, i32, i32) {
    %c0_i32 = arith.constant 0 : i32
    %c0_i32_0 = arith.constant 0 : i32
    return %arg0, %c0_i32, %arg1 : i32, i32, i32
  }
  func.func @transform_1(%arg0: i32, %arg1: i32) -> (i32, i32) {
    %c0_i32 = arith.constant 0 : i32
    %c0_i32_0 = arith.constant 0 : i32
    %c0_i32_1 = arith.constant 0 : i32
    return %c0_i32, %c0_i32_0 : i32, i32
  }
  func.func @transform_2(%arg0: i32, %arg1: i32) -> (i32, i32, i32) {
    %c0_i32 = arith.constant 0 : i32
    %c0_i32_0 = arith.constant 0 : i32
    return %arg0, %c0_i32, %arg1 : i32, i32, i32
  }
}

</mosaic_0001>

<bundles_post_ra>
// kernel: tpu_custom_call.1
= control target key start
LH: loop header
LB: loop body
LE: loop exit
PB: predicated region body
PF: predicated region fallthrough
CT: control target
= control target key end

     0   :  { %s488_s9 = smov 0   ;;  %s490_s10 = smov 0   ;;  %s544_s0 = inlined_call_operand.vmem [shape: f32[2,16,128], index: 0, kind: input, shape index: {}]   ;;  %s545_s1 = inlined_call_operand.vmem [shape: f32[32,16], index: 1, kind: input, shape index: {}]   ;;  %s546_s2 = inlined_call_operand.vmem [shape: f32[2,9,128], index: 2, kind: output, shape index: {}]  }
   0x1   :  { %s492_s11 = smov 0  }
   0x2 LB: > { %s24_s12 = sadd.s32 1, %s467_s10  ;;  %p388_p0 = scmp.ge.s32.totalorder %s471_s11, 1  ;;  %s471_s11 = sphi %s492_s11, %s12_s11   ;;  %s467_s10 = sphi %s490_s10, %s548_s10   ;;  %s463_s9 = sphi %s488_s9, %s547_s9  }
   0x3   : > { %p26_p1 = scmp.ge.s32.totalorder %s24_s12, 2  ;;  %p131_p2 = scmp.lt.s32.totalorder %s471_s11, 3 }
   0x5   : > { %s550_s12 = smov (%p26_p1, %s24_s12), 0  ;;  %p132_p3 = pnand %p388_p0, %p131_p2 }
   0x6   : > { %p159_p4 = scmp.lt.s32.totalorder (!%p132_p3), %s463_s9, 1 }
   0x7   : > { %135 = sbr.rel (%p132_p3) target bundleno = 238 (0xee), region = 28 }
   0xc   : > { %v175_v0 = vld [vmem:[%s545_s1] sm:$0xff]  ;;  %vm181_vm0 = vcmask 130048   ;;  %v177_v1 = vld [vmem:[%s545_s1 + $0x10] sm:$0xff]  ;;  %s552_s9 = smov (!%p159_p4, %s463_s9), 1  ;;  %v176_v4 = vld [vmem:[%s545_s1 + $0x8] sm:$0xff] }
   0xd   : > { %411 = vmatprep.mubr.msk.f32.mxu0 %vm181_vm0, %v175_v0  ;;  %414 = vmatprep.mubr.msk.f32.mxu1 %vm181_vm0, %v177_v1  ;;  %s399_s17 = sshll.u32 %s552_s9, 4  ;;  %v178_v5 = vld [vmem:[%s545_s1 + $0x18] sm:$0xff] }
   0xe   : > { %s166_s20 = scalar_lea.vmem %s544_s0, %s399_s17  ;;  %s174_s27 = scalar_lea.vmem %s546_s2, %s399_s17 }
   0xf   : > { %v180_v2 = vld [vmem:[%s166_s20 + $0x8] sm:$0xff]  ;;  %v179_v3 = vld [vmem:[%s166_s20] sm:$0xff] }
  0x10   : > { %407 = vmatprep.subr.mxu0 %v180_v2  ;;  %417 = vmatprep.subr.mxu1 %v180_v2 }
  0x11   : > { %408 = vmatpush3.msra.mxu0 %v180_v2  ;;  %419 = vmatpush3.msra.mxu1 %v180_v2 }
  0x12   : > { %409 = vmatprep.subr.mxu0 %v179_v3  ;;  %418 = vmatprep.subr.mxu1 %v179_v3 }
  0x13   : > { %410 = vmatpush3.msra.mxu0 %v179_v3  ;;  %420 = vmatpush3.msra.mxu1 %v179_v3 }
  0x14   : > { %412 = vmatmul.mubr.msk.f32.vlgmr.msra.gmra.mxu0 %vm181_vm0, %v176_v4  ;;  %415 = vmatmul.mubr.msk.f32.vlgmr.msra.gmra.mxu1 %vm181_vm0, %v178_v5 }
  0xd4   : > { %v413_v6 = vpop.f32.mrf.mxu0  ;;  %v416_v7 = vpop.f32.mrf.mxu1 }
  0xd5   : > { %v280_v8 = vmul.f32 %v413_v6, %v413_v6  ;;  %v282_v9 = vmul.f32 %v416_v7, %v416_v7 }
  0xd6   : > { %v260_v10 = vpop.f32.mrf.mxu0  ;;  %v270_v11 = vpop.f32.mrf.mxu1 }
  0xd7   : > { %v284_v12 = vadd.f32 %v282_v9, %v280_v8  ;;  %v279_v13 = vmul.f32 %v260_v10, %v260_v10  ;;  %v281_v14 = vmul.f32 %v270_v11, %v270_v11 }
  0xd9   : > { %445 = vrsqrt.f32 %v284_v12  ;;  %v283_v15 = vadd.f32 %v281_v14, %v279_v13  ;;  %vm294_vm1 = vcmp.eq.f32.partialorder %v284_v12, inf  ;;  %v297_v18 = vand.u32 2147483648, %v284_v12 }
  0xda   : > { %vm296_vm2 = vcmp.eq.f32.partialorder %v284_v12, 0.0 }
  0xdb   : > { %447 = vrsqrt.f32 %v283_v15  ;;  %vm287_vm3 = vcmp.eq.f32.partialorder %v283_v15, inf  ;;  %v290_v23 = vand.u32 2147483648, %v283_v15  ;;  %vm289_vm4 = vcmp.eq.f32.partialorder %v283_v15, 0.0 }
  0xe6   : > { %v446_v16 = vpop.eup %445 }
  0xe7   : > { %v293_v17 = vmul.f32 %v446_v16, %v284_v12 }
  0xe8   : > { %v448_v19 = vpop.eup %447 }
  0xe9   : > { %v295_v20 = vsel %vm294_vm1, %v284_v12, %v293_v17  ;;  %v286_v22 = vmul.f32 %v448_v19, %v283_v15 }
  0xea   : > { %v298_v21 = vsel %vm296_vm2, %v297_v18, %v295_v20 }
  0xeb   : > { %300 = vst [vmem:[%s174_s27 + $0x8] sm:$0x1] %v298_v21  ;;  %v288_v24 = vsel %vm287_vm3, %v283_v15, %v286_v22 }
  0xec   : > { %v291_v25 = vsel %vm289_vm4, %v290_v23, %v288_v24 }
  0xed   : > { %299 = vst [vmem:[%s174_s27] sm:$0xff] %v291_v25 }
  0xee PF: > { %s12_s11 = sadd.s32 1, %s471_s11   ;;  %s547_s9 = smov %s467_s10 }
  0xef   : > { %p9_p5 = scmp.ge.s32.totalorder %s12_s11, 4   ;;  %s548_s10 = smov %s550_s12 }
  0xf1   :  { %11 = sbr.rel (!%p9_p5) target bundleno = 2 (0x2), region = 58 }

</bundles_post_ra>
